<compile_context>
chip_gen: v7x
topology: tpu7x:2x2x1
jax: 0.10.0
libtpu: 0.0.40
codegen_flags: <defaults>
</compile_context>

<pallas_src>
import jax
import jax.numpy as jnp
from jax.experimental import pallas as pl
from jax.experimental.pallas import tpu as pltpu


def _mlp3_kernel(x_ref, w1_ref, b1_ref, w2_ref, b2_ref, w3_ref, b3_ref, y_ref):
    # fc1: (TM, F_IN) @ (F_IN, H1p) + (1, H1p)
    h = jnp.dot(x_ref[...], w1_ref[...], preferred_element_type=jnp.float32)
    h = h + b1_ref[...]
    # ll2: (TM, H1p) @ (H1p, H2p) + (1, H2p)
    h = jnp.dot(h, w2_ref[...], preferred_element_type=jnp.float32)
    h = h + b2_ref[...]
    # ll3: (TM, H2p) @ (H2p, OUTp) + (1, OUTp)   (lane-padded by the wrapper)
    y = jnp.dot(h, w3_ref[...], preferred_element_type=jnp.float32)
    y = y + b3_ref[...]
    y_ref[...] = y.astype(y_ref.dtype)


def _round_up(v, m):
    return ((v + m - 1) // m) * m


def _pad2d(a, rows, cols):
    """Zero-pad a 2-D array up to (rows, cols)."""
    r, c = a.shape
    if r == rows and c == cols:
        return a
    return jnp.zeros((rows, cols), a.dtype).at[:r, :c].set(a)


def model_linear_forward(x, params, *, tm=128):
    """y = ((x @ W1 + b1) @ W2 + b2) @ W3 + b3, fused in one Pallas kernel."""
    w1, b1 = params["w1"], params["b1"]
    w2, b2 = params["w2"], params["b2"]
    w3, b3 = params["w3"], params["b3"]

    m, f_in = x.shape
    h1 = w1.shape[1]
    h2 = w2.shape[1]
    n_out = w3.shape[1]

    # Lane-dense feature dims: pad hidden/output feature dims to multiples of
    # 128 (weights & biases only; zero padding is exact, see header comment).
    h1p = _round_up(h1, 128)
    h2p = _round_up(h2, 128)
    outp = _round_up(n_out, 128)

    w1p = _pad2d(w1, f_in, h1p)
    b1p = _pad2d(b1, 1, h1p)
    w2p = _pad2d(w2, h1p, h2p)
    b2p = _pad2d(b2, 1, h2p)
    w3p = _pad2d(w3, h2p, outp)
    b3p = _pad2d(b3, 1, outp)

    # Row tiling: shrink the tile to the (8-aligned) batch if the batch is
    # small, then pad the batch up to a whole number of tiles.
    tm = max(8, _round_up(min(tm, _round_up(m, 8)), 8))
    m_pad = _round_up(m, tm)
    if m_pad != m:
        x = jnp.zeros((m_pad, f_in), x.dtype).at[:m, :].set(x)

    grid = (m_pad // tm,)

    # Weights/biases: same block on every grid step -> DMA'd once, VMEM-resident.
    def const(shape):
        return pl.BlockSpec(shape, lambda i: (0, 0))

    flops = 2 * m_pad * (f_in * h1p + h1p * h2p + h2p * outp)
    bytes_accessed = 4 * (
        m_pad * f_in + m_pad * outp
        + f_in * h1p + h1p + h1p * h2p + h2p + h2p * outp + outp
    )

    y_pad = pl.pallas_call(
        _mlp3_kernel,
        out_shape=jax.ShapeDtypeStruct((m_pad, outp), jnp.float32),
        grid=grid,
        in_specs=[
            pl.BlockSpec((tm, f_in), lambda i: (i, 0)),  # x: row-tiled
            const((f_in, h1p)), const((1, h1p)),         # fc1
            const((h1p, h2p)), const((1, h2p)),          # ll2
            const((h2p, outp)), const((1, outp)),        # ll3 (lane-padded)
        ],
        out_specs=pl.BlockSpec((tm, outp), lambda i: (i, 0)),
        compiler_params=pltpu.CompilerParams(
            dimension_semantics=("parallel",),           # shards rows on v7x 2-TC
            vmem_limit_bytes=32 * 1024 * 1024,
        ),
        cost_estimate=pl.CostEstimate(
            flops=flops, transcendentals=0, bytes_accessed=bytes_accessed
        ),
    )(x, w1p, b1p, w2p, b2p, w3p, b3p)

    return y_pad[:m, :n_out]


def _reference_forward(x, params):
    """Pure-JAX reference matching the PyTorch forward."""
    h = x @ params["w1"] + params["b1"]
    h = h @ params["w2"] + params["b2"]
    return h @ params["w3"] + params["b3"]


def init_params(key, f_in, h1, h2, n_out):
    ks = jax.random.split(key, 6)
    s = 0.1
    return {
        "w1": jax.random.normal(ks[0], (f_in, h1), jnp.float32) * s,
        "b1": jax.random.normal(ks[1], (1, h1), jnp.float32) * s,
        "w2": jax.random.normal(ks[2], (h1, h2), jnp.float32) * s,
        "b2": jax.random.normal(ks[3], (1, h2), jnp.float32) * s,
        "w3": jax.random.normal(ks[4], (h2, n_out), jnp.float32) * s,
        "b3": jax.random.normal(ks[5], (1, n_out), jnp.float32) * s,
    }


if __name__ == "__main__":
    key = jax.random.PRNGKey(0)
    M, F_IN, H1, H2, N_OUT = 64, 16, 32, 32, 4

    kx, kp = jax.random.split(key)
    x = jax.random.normal(kx, (M, F_IN), jnp.float32)
    params = init_params(kp, F_IN, H1, H2, N_OUT)

    # tm=32 -> 2 grid steps even at this small batch (exercises the row tiling).
    y = model_linear_forward(x, params, tm=32)
    jax.block_until_ready(y)

    y_ref = _reference_forward(x, params)
    assert y.shape == (M, N_OUT), f"bad shape {y.shape}"
    assert jnp.allclose(y, y_ref, atol=1e-4, rtol=1e-4), "ModelLinear mismatch"

    print("KERNEL_OK")
</pallas_src>

<mosaic_0001>
module attributes {stable_mosaic.version = 11 : i64} {
  func.func @_mlp3_kernel(%arg0: i32, %arg1: memref<32x16xf32, #tpu.memory_space<vmem>>, %arg2: memref<16x128xf32, #tpu.memory_space<vmem>>, %arg3: memref<1x128xf32, #tpu.memory_space<vmem>>, %arg4: memref<128x128xf32, #tpu.memory_space<vmem>>, %arg5: memref<1x128xf32, #tpu.memory_space<vmem>>, %arg6: memref<128x128xf32, #tpu.memory_space<vmem>>, %arg7: memref<1x128xf32, #tpu.memory_space<vmem>>, %arg8: memref<32x128xf32, #tpu.memory_space<vmem>>) attributes {dimension_semantics = [#tpu.dimension_semantics<parallel>], iteration_bounds = array<i64: 2>, scalar_prefetch = 0 : i64, scratch_operands = 0 : i64, tpu.core_type = #tpu.core_type<tc>, window_params = [{transform_indices = @transform_0, window_bounds = array<i64: 32, 16>}, {pipeline_mode = #tpu.pipeline_mode<synchronous>, transform_indices = @transform_1, window_bounds = array<i64: 16, 128>}, {pipeline_mode = #tpu.pipeline_mode<synchronous>, transform_indices = @transform_2, window_bounds = array<i64: 1, 128>}, {pipeline_mode = #tpu.pipeline_mode<synchronous>, transform_indices = @transform_3, window_bounds = array<i64: 128, 128>}, {pipeline_mode = #tpu.pipeline_mode<synchronous>, transform_indices = @transform_4, window_bounds = array<i64: 1, 128>}, {pipeline_mode = #tpu.pipeline_mode<synchronous>, transform_indices = @transform_5, window_bounds = array<i64: 128, 128>}, {pipeline_mode = #tpu.pipeline_mode<synchronous>, transform_indices = @transform_6, window_bounds = array<i64: 1, 128>}, {transform_indices = @transform_7, window_bounds = array<i64: 32, 128>}]} {
    %c0 = arith.constant 0 : index
    %c0_0 = arith.constant 0 : index
    %0 = vector.load %arg1[%c0, %c0_0] : memref<32x16xf32, #tpu.memory_space<vmem>>, vector<32x16xf32>
    %c0_1 = arith.constant 0 : index
    %c0_2 = arith.constant 0 : index
    %1 = vector.load %arg2[%c0_1, %c0_2] : memref<16x128xf32, #tpu.memory_space<vmem>>, vector<16x128xf32>
    %cst = arith.constant dense<0.000000e+00> : vector<32x128xf32>
    %2 = tpu.matmul %0, %1, %cst {dimension_numbers = #tpu.dot_dimension_numbers<[1], [0], [0], [1], [0, 0, 1, 1], [], []>} : vector<32x16xf32>, vector<16x128xf32>, vector<32x128xf32> -> vector<32x128xf32>
    %c0_3 = arith.constant 0 : index
    %c0_4 = arith.constant 0 : index
    %3 = vector.load %arg3[%c0_3, %c0_4] : memref<1x128xf32, #tpu.memory_space<vmem>>, vector<1x128xf32>
    %4 = vector.broadcast %3 : vector<1x128xf32> to vector<32x128xf32>
    %5 = arith.addf %2, %4 : vector<32x128xf32>
    %c0_5 = arith.constant 0 : index
    %c0_6 = arith.constant 0 : index
    %6 = vector.load %arg4[%c0_5, %c0_6] : memref<128x128xf32, #tpu.memory_space<vmem>>, vector<128x128xf32>
    %cst_7 = arith.constant dense<0.000000e+00> : vector<32x128xf32>
    %7 = tpu.matmul %5, %6, %cst_7 {dimension_numbers = #tpu.dot_dimension_numbers<[1], [0], [0], [1], [0, 0, 1, 1], [], []>} : vector<32x128xf32>, vector<128x128xf32>, vector<32x128xf32> -> vector<32x128xf32>
    %c0_8 = arith.constant 0 : index
    %c0_9 = arith.constant 0 : index
    %8 = vector.load %arg5[%c0_8, %c0_9] : memref<1x128xf32, #tpu.memory_space<vmem>>, vector<1x128xf32>
    %9 = vector.broadcast %8 : vector<1x128xf32> to vector<32x128xf32>
    %10 = arith.addf %7, %9 : vector<32x128xf32>
    %c0_10 = arith.constant 0 : index
    %c0_11 = arith.constant 0 : index
    %11 = vector.load %arg6[%c0_10, %c0_11] : memref<128x128xf32, #tpu.memory_space<vmem>>, vector<128x128xf32>
    %cst_12 = arith.constant dense<0.000000e+00> : vector<32x128xf32>
    %12 = tpu.matmul %10, %11, %cst_12 {dimension_numbers = #tpu.dot_dimension_numbers<[1], [0], [0], [1], [0, 0, 1, 1], [], []>} : vector<32x128xf32>, vector<128x128xf32>, vector<32x128xf32> -> vector<32x128xf32>
    %c0_13 = arith.constant 0 : index
    %c0_14 = arith.constant 0 : index
    %13 = vector.load %arg7[%c0_13, %c0_14] : memref<1x128xf32, #tpu.memory_space<vmem>>, vector<1x128xf32>
    %14 = vector.broadcast %13 : vector<1x128xf32> to vector<32x128xf32>
    %15 = arith.addf %12, %14 : vector<32x128xf32>
    %c0_15 = arith.constant 0 : index
    %c0_16 = arith.constant 0 : index
    %16 = vector.load %arg8[%c0_15, %c0_16] : memref<32x128xf32, #tpu.memory_space<vmem>>, vector<32x128xf32>
    tpu.vector_store %arg8[%c0_15, %c0_16], %15 {strides = array<i32>} : memref<32x128xf32, #tpu.memory_space<vmem>>, vector<32x128xf32>,
    return
  }
  func.func @transform_0(%arg0: i32) -> (i32, i32) {
    %c0_i32 = arith.constant 0 : i32
    %c0_i32_0 = arith.constant 0 : i32
    return %arg0, %c0_i32 : i32, i32
  }
  func.func @transform_1(%arg0: i32) -> (i32, i32) {
    %c0_i32 = arith.constant 0 : i32
    %c0_i32_0 = arith.constant 0 : i32
    %c0_i32_1 = arith.constant 0 : i32
    return %c0_i32, %c0_i32_0 : i32, i32
  }
  func.func @transform_2(%arg0: i32) -> (i32, i32) {
    %c0_i32 = arith.constant 0 : i32
    %c0_i32_0 = arith.constant 0 : i32
    %c0_i32_1 = arith.constant 0 : i32
    return %c0_i32, %c0_i32_0 : i32, i32
  }
  func.func @transform_3(%arg0: i32) -> (i32, i32) {
    %c0_i32 = arith.constant 0 : i32
    %c0_i32_0 = arith.constant 0 : i32
    %c0_i32_1 = arith.constant 0 : i32
    return %c0_i32, %c0_i32_0 : i32, i32
  }
  func.func @transform_4(%arg0: i32) -> (i32, i32) {
    %c0_i32 = arith.constant 0 : i32
    %c0_i32_0 = arith.constant 0 : i32
    %c0_i32_1 = arith.constant 0 : i32
    return %c0_i32, %c0_i32_0 : i32, i32
  }
  func.func @transform_5(%arg0: i32) -> (i32, i32) {
    %c0_i32 = arith.constant 0 : i32
    %c0_i32_0 = arith.constant 0 : i32
    %c0_i32_1 = arith.constant 0 : i32
    return %c0_i32, %c0_i32_0 : i32, i32
  }
  func.func @transform_6(%arg0: i32) -> (i32, i32) {
    %c0_i32 = arith.constant 0 : i32
    %c0_i32_0 = arith.constant 0 : i32
    %c0_i32_1 = arith.constant 0 : i32
    return %c0_i32, %c0_i32_0 : i32, i32
  }
  func.func @transform_7(%arg0: i32) -> (i32, i32) {
    %c0_i32 = arith.constant 0 : i32
    %c0_i32_0 = arith.constant 0 : i32
    return %arg0, %c0_i32 : i32, i32
  }
}

</mosaic_0001>

<bundles_post_ra>
// kernel: tpu_custom_call.1
= control target key start
LH: loop header
LB: loop body
LE: loop exit
PB: predicated region body
PF: predicated region fallthrough
CT: control target
= control target key end

     0   :  { %12 = vsyncpa [#allocation3], 0  ;;  %s1395_s0 = inlined_call_operand.vmem [shape: f32[64,16], index: 0, kind: input, shape index: {}]   ;;  %s1396_s1 = inlined_call_operand.vmem [shape: f32[16,128], index: 1, kind: input, shape index: {}]   ;;  %s1397_s2 = inlined_call_operand.vmem [shape: f32[1,128], index: 2, kind: input, shape index: {}]   ;;  %s1398_s3 = inlined_call_operand.hbm [shape: f32[128,128], index: 3, kind: input, shape index: {}]   ;;  %s1399_s4 = inlined_call_operand.vmem [shape: f32[1,128], index: 4, kind: input, shape index: {}]   ;;  %s1400_s5 = inlined_call_operand.hbm [shape: f32[128,128], index: 5, kind: input, shape index: {}]   ;;  %s1401_s6 = inlined_call_operand.vmem [shape: f32[1,128], index: 6, kind: input, shape index: {}]   ;;  %s1402_s7 = inlined_call_operand.hbm [shape: f32[64,128], index: 7, kind: output, shape index: {}]  }
   0x1   :  { %13 = vsyncpa [#allocation6], 0 }
   0x2   :  { %14 = vsyncpa [#allocation4], 0 }
   0x3   :  { %16 = vsyncpa [#allocation4 + $0x1], 0  ;;  %s1202_s24 = smov 0   ;;  %s1204_s25 = smov 0  }
   0x4   :  { %s1206_s26 = smov 0   ;;  %s1208_s27 = smov 0  }
   0x5 LB: > { %s1223_s28 = sadd.s32 4294967295, %s1153_s27   ;;  %s739_s29 = sadd.s32 4294967294, %s1153_s27   ;;  %s1153_s27 = sphi %s1208_s27, %s1422_s27   ;;  %s1149_s26 = sphi %s1206_s26, %s1421_s26   ;;  %s1145_s25 = sphi %s1204_s25, %s1420_s25   ;;  %s1141_s24 = sphi %s1202_s24, %s1419_s24  }
   0x6   : > { %s1227_s30 = sadd.s32 1, %s1153_s27   ;;  %s181_s8 = sadd.s32 1, %s1149_s26 }
   0x7   : > { %s178_s9 = ssub.s32 %s1153_s27, %s1227_s30  ;;  %p191_p0 = scmp.ne.s32.totalorder %s1149_s26, %s1145_s25 }
   0x8   : > { %p179_p1 = scmp.eq.s32.totalorder %s178_s9, 0  ;;  %p192_p2 = scmp.eq.s32.totalorder %s1223_s28, 1 }
   0x9   : > { %p197_p3 = scmp.ne.s32.totalorder %s1145_s25, %s1141_s24  ;;  %p198_p4 = scmp.eq.s32.totalorder %s739_s29, 1 }
   0xa   : > { %s1238_s10 = scalar_select %p179_p1, %s1149_s26, %s181_s8  }
   0xb   : > { %p1240_p5 = por %p192_p2, %p191_p0  ;;  %p1244_p6 = por %p198_p4, %p197_p3 }
   0xc   : > { %1406 = sst [smem:[#allocation11_spill]] %s1238_s10  ;;  %p740_p7 = scmp.ge.s32.totalorder %s1153_s27, 1 }
   0xd   : > { %s1407_s11 = scalar_select %p1240_p5, 1, 0 }
   0xe   : > { %s1408_s12 = scalar_select %p1244_p6, 1, 0 }
   0xf   : > { %p205_p8 = scmp.lt.s32.totalorder %s1153_s27, 3  ;;  %p1403_p9 = scmp.eq.s32.totalorder %s1223_s28, 0 }
  0x10   : > { %s1155_s14 = smov [#allocation2]   ;;  %s1156_s17 = smov [#allocation5]  }
  0x11   : > { %p1251_p10 = pnand %p740_p7, %p205_p8  ;;  %s223_s15 = sshll.u32 %s1155_s14, 4  ;;  %s224_s15 = int_to_ptr.vmem [resolvable:$true] %s223_s15 }
  0x12   : > { %s239_s18 = sshll.u32 %s1156_s17, 4  ;;  %s1027_s21 = scalar_lea.hbm %s1398_s3, 2048  ;;  %s1263_s18 = int_to_ptr.vmem [resolvable:$true] %s239_s18 }
  0x13   : > { %s1409_s13 = scalar_select %p1251_p10, 1, 0 }
  0x14   : > { %p973_p11 = pneg %p1251_p10  ;;  %p1028_p13 = scmp.ne.s32.totalorder %s1398_s3, %s1027_s21 }
  0x15   : > { %p1034_p3 = scmp.lt.u32.totalorder %s1027_s21, %s1398_s3 }
  0x16   : > { %p1259_p12 = pnand %p1403_p9, %p973_p11 }
  0x18   : > { %p1029_p0 = pneg %p1259_p12 }
  0x1a   : > { %p1030_p1 = pnand %p1029_p0, %p1028_p13 }
  0x1c   : > { %p1031_p2 = pneg %p1030_p1 }
  0x1e   : > { %p1036_p4 = pnand %p1034_p3, %p1031_p2 }
  0x20   : > { %1039 = shalt.err (!%p1036_p4)
}
  0x21   : > { %s1040_s9 = scalar_lea.vmem %s224_s15, 2048  ;;  %p1048_p9 = scmp.lt.s32.totalorder %s224_s15, %s224_s15 }
  0x22   : > { %p1041_p7 = scmp.ne.s32.totalorder %s224_s15, %s1040_s9  ;;  %p1049_p6 = scmp.lt.s32.totalorder %s1040_s9, %s1040_s9 }
  0x24   : > { %p1043_p8 = pnand %p1041_p7, %p1029_p0  ;;  %p1050_p5 = por %p1049_p6, %p1048_p9 }
  0x26   : > { %p1044_p11 = pneg %p1043_p8 }
  0x28   : > { %p1051_p10 = pnand %p1050_p5, %p1044_p11 }
  0x2a   : > { %1054 = shalt.err (!%p1051_p10)
}
  0x2b   : > { %s1157_s14 = smov 128   ;;  %s1158_s17 = smov 8  }
  0x2c   : > { %976 = dma.hbm_to_vmem [thread:$0]  (!%p1259_p12), %s1398_s3, 2048, %s224_s15, [#allocation3], %s1157_s14, %s1157_s14, %s1158_s17  }
  0x2d   : > { %s1055_s23 = scalar_lea.hbm %s1400_s5, 2048 }
  0x2e   : > { %p1056_p13 = scmp.ne.s32.totalorder %s1400_s5, %s1055_s23  ;;  %p1062_p9 = scmp.lt.u32.totalorder %s1055_s23, %s1400_s5 }
  0x30   : > { %p1058_p5 = pnand %p1056_p13, %p1029_p0 }
  0x32   : > { %p1059_p6 = pneg %p1058_p5 }
  0x34   : > { %p1064_p10 = pnand %p1062_p9, %p1059_p6 }
  0x36   : > { %1067 = shalt.err (!%p1064_p10)
}
  0x37   : > { %s1068_s15 = scalar_lea.vmem %s1263_s18, 2048  ;;  %p1076_p4 = scmp.lt.s32.totalorder %s1263_s18, %s1263_s18 }
  0x38   : > { %p1069_p1 = scmp.ne.s32.totalorder %s1263_s18, %s1068_s15  ;;  %p1077_p7 = scmp.lt.s32.totalorder %s1068_s15, %s1068_s15 }
  0x3a   : > { %p1071_p2 = pnand %p1069_p1, %p1029_p0  ;;  %p1078_p8 = por %p1077_p7, %p1076_p4 }
  0x3c   : > { %p1072_p3 = pneg %p1071_p2 }
  0x3e   : > { %p1079_p11 = pnand %p1078_p8, %p1072_p3 }
  0x40   : > { %1082 = shalt.err (!%p1079_p11)
}
  0x41   : > { %979 = dma.hbm_to_vmem [thread:$0]  (!%p1259_p12), %s1400_s5, 2048, %s1263_s18, [#allocation6], %s1157_s14, %s1157_s14, %s1158_s17  }
  0x42   : > { %p1411_p13 = scmp.ne.s32.totalorder %s1409_s13, 0 }
  0x43   : > { %p1412_p5 = scmp.eq.s32.totalorder (!%p1411_p13), %s1223_s28, 0 }
  0x44   : > { %267 = sbr.rel (%p1411_p13) target bundleno = 754 (0x2f2), region = 48 }
  0x4b   : > { %1128 = dma.done.wait (%p1412_p5), [#allocation3], 2048   ;;  %p1413_p0 = pmov %p1412_p5 }
  0x4d   : > { %1130 = vsyncadd (%p1413_p0), [#allocation3], 4294965248  ;;  %p1414_p6 = pmov %p1413_p0 }
  0x4e   : > { %p1415_p9 = pmov %p1413_p0 }
  0x4f   : > { %1132 = dma.done.wait (%p1414_p6), [#allocation6], 2048  }
  0x50   : > { %1134 = vsyncadd (%p1415_p9), [#allocation6], 4294965248  ;;  %s748_s16 = sshll.u32 %s1223_s28, 2  ;;  %vm323_vm0 = vcmask 130048   ;;  %v314_v0 = vld [vmem:[%s1396_s1] sm:$0xff]  ;;  %v315_v1 = vld [vmem:[%s1396_s1 + $0x8] sm:$0xff] }
  0x51   : > { %p304_p10 = scmp.lt.s32.totalorder %s748_s16, 7  ;;  %v895_v3 = vpack.c.bf16 %v315_v1, %v314_v0  ;;  %v421_v4 = vld [vmem:[#allocation2] sm:$0xff]  ;;  %v422_v5 = vld [vmem:[#allocation2 + $0x8] sm:$0xff]  ;;  %v423_v6 = vld [vmem:[#allocation2 + $0x10] sm:$0xff]  ;;  %s300_s10 = sand.u32 1, %s1145_s25  }
  0x52   : > { %v899_v7 = vpack.c.bf16 %v422_v5, %v421_v4  ;;  %v424_v8 = vld [vmem:[#allocation2 + $0x18] sm:$0xff]  ;;  %v425_v11 = vld [vmem:[#allocation2 + $0x20] sm:$0xff]  ;;  %v426_v12 = vld [vmem:[#allocation2 + $0x28] sm:$0xff]  ;;  %s747_s19 = sshll.u32 %s300_s10, 5  ;;  %s1354_s23 = scalar_lea.sflag [#allocation4], %s300_s10 }
  0x53   : > { %s1424_s16 = smov (!%p304_p10, %s748_s16), 7  ;;  %896 = vmatprep.subr.bf16.mxu0 %v895_v3  ;;  %v903_v10 = vpack.c.bf16 %v424_v8, %v423_v6  ;;  %v907_v14 = vpack.c.bf16 %v426_v12, %v425_v11  ;;  %v427_v16 = vld [vmem:[#allocation2 + $0x30] sm:$0xff]  ;;  %v428_v17 = vld [vmem:[#allocation2 + $0x38] sm:$0xff]  ;;  %v429_v19 = vld [vmem:[#allocation2 + $0x40] sm:$0xff]  ;;  %s302_s13 = scalar_lea.vmem [#allocation7], %s747_s19 }
  0x54   : > { %s749_s18 = sshll.u32 %s1424_s16, 3  ;;  %898 = vmatpush3.bf16.msra.mxu0 %v895_v3  ;;  %900 = vmatprep.subr.bf16.mxu1 %v899_v7  ;;  %v911_v18 = vpack.c.bf16 %v428_v17, %v427_v16  ;;  %v430_v20 = vld [vmem:[#allocation2 + $0x48] sm:$0xff]  ;;  %v431_v22 = vld [vmem:[#allocation2 + $0x50] sm:$0xff]  ;;  %v432_v23 = vld [vmem:[#allocation2 + $0x58] sm:$0xff]  ;;  %s655_s14 = sshll.u32 %s302_s13, 4  ;;  %s1347_s14 = int_to_ptr.vmem [resolvable:$true] %s655_s14 }
  0x55   : > { %s307_s17 = scalar_lea.vmem %s1395_s0, %s749_s18  ;;  %902 = vmatpush3.bf16.msra.mxu1 %v899_v7  ;;  %v915_v21 = vpack.c.bf16 %v430_v20, %v429_v19  ;;  %v919_v24 = vpack.c.bf16 %v432_v23, %v431_v22  ;;  %v433_v25 = vld [vmem:[#allocation2 + $0x60] sm:$0xff]  ;;  %v434_v26 = vld [vmem:[#allocation2 + $0x68] sm:$0xff]  ;;  %v435_v28 = vld [vmem:[#allocation2 + $0x70] sm:$0xff]  ;;  %p1416_p1 = scmp.ne.s32.totalorder %s1407_s11, 0 }
  0x56   : > { %v310_v2 = vld [vmem:[%s307_s17] sm:$0xff]  ;;  %v311_v9 = vld [vmem:[%s307_s17 + $0x8] sm:$0xff]  ;;  %v312_v13 = vld [vmem:[%s307_s17 + $0x10] sm:$0xff]  ;;  %904 = vmatprep.subr.bf16.mxu1 %v903_v10  ;;  %v923_v27 = vpack.c.bf16 %v434_v26, %v433_v25  ;;  %s1159_s29 = smov [#allocation7]  }
  0x57   : > { %813 = vmatprep.mubr.msk.f32.mxu0 %vm323_vm0, %v310_v2  ;;  %v313_v15 = vld [vmem:[%s307_s17 + $0x18] sm:$0xff]  ;;  %v529_v31 = vld [vmem:[#allocation5] sm:$0xff]  ;;  %v530_v32 = vld [vmem:[#allocation5 + $0x8] sm:$0xff]  ;;  %s762_s17 = sshll.u32 %s1223_s28, 9  ;;  %s1083_s28 = scalar_lea.vmem %s1347_s14, 512 }
  0x58   : > { %814 = vmatmul.mubr.msk.f32.vlgmr.msra.gmra.mrb[0].mxu0 %vm323_vm0, %v311_v9  ;;  %v436_v29 = vld [vmem:[#allocation2 + $0x78] sm:$0xff]  ;;  %v531_v33 = vld [vmem:[#allocation5 + $0x10] sm:$0xff]  ;;  %v931_v34 = vpack.c.bf16 %v530_v32, %v529_v31  ;;  %v533_v37 = vld [vmem:[#allocation5 + $0x20] sm:$0xff]  ;;  %s1352_s22 = scalar_lea.hbm %s1402_s7, %s762_s17  ;;  %p1084_p12 = scmp.ne.s32.totalorder %s1347_s14, %s1083_s28 }
  0x59   : > { %816 = vmatprep.mubr.msk.f32.mxu0 %vm323_vm0, %v312_v13  ;;  %906 = vmatpush3.bf16.msra.mxu1 %v903_v10  ;;  %v927_v30 = vpack.c.bf16 %v436_v29, %v435_v28  ;;  %v532_v35 = vld [vmem:[#allocation5 + $0x18] sm:$0xff]  ;;  %v534_v38 = vld [vmem:[#allocation5 + $0x28] sm:$0xff]  ;;  %v535_v40 = vld [vmem:[#allocation5 + $0x30] sm:$0xff]  ;;  %s1087_s8 = sshll.u32 %s1159_s29, 4  ;;  %s1088_s8 = int_to_ptr.vmem [resolvable:$false] %s1087_s8 }
  0x5a   : > { %908 = vmatprep.subr.bf16.mxu1 %v907_v14  ;;  %v935_v36 = vpack.c.bf16 %v532_v35, %v531_v33  ;;  %932 = vmatprep.subr.bf16.mxu0 %v931_v34  ;;  %v939_v39 = vpack.c.bf16 %v534_v38, %v533_v37  ;;  %v536_v41 = vld [vmem:[#allocation5 + $0x38] sm:$0xff]  ;;  %v537_v43 = vld [vmem:[#allocation5 + $0x40] sm:$0xff]  ;;  %v538_v44 = vld [vmem:[#allocation5 + $0x48] sm:$0xff]  ;;  %p1085_p2 = pnand %p1084_p12, %p1416_p1  ;;  %s1089_s9 = scalar_lea.vmem %s1088_s8, 1024 }
  0x5b   : > { %934 = vmatpush3.bf16.msra.mxu0 %v931_v34  ;;  %v943_v42 = vpack.c.bf16 %v536_v41, %v535_v40  ;;  %v947_v45 = vpack.c.bf16 %v538_v44, %v537_v43  ;;  %v539_v46 = vld [vmem:[#allocation5 + $0x50] sm:$0xff]  ;;  %v540_v47 = vld [vmem:[#allocation5 + $0x58] sm:$0xff]  ;;  %v541_v49 = vld [vmem:[#allocation5 + $0x60] sm:$0xff]  ;;  %p1090_p4 = scmp.lt.s32.totalorder %s1347_s14, %s1088_s8  ;;  %p1091_p7 = scmp.lt.s32.totalorder %s1089_s9, %s1083_s28 }
  0x5c   : > { %817 = vmatmul.mubr.msk.f32.gmra.mrb[2].mxu0 %vm323_vm0, %v313_v15  ;;  %936 = vmatprep.subr.bf16.mxu0 %v935_v36  ;;  %v951_v48 = vpack.c.bf16 %v540_v47, %v539_v46  ;;  %v542_v50 = vld [vmem:[#allocation5 + $0x68] sm:$0xff]  ;;  %v750_v52 = vld [vmem:[%s1397_s2] ss:$0 sm:$0xff]  ;;  %v543_v61 = vld [vmem:[#allocation5 + $0x70] sm:$0xff]  ;;  %p1086_p3 = pneg %p1085_p2 }
  0x5d   : > { %910 = vmatpush3.bf16.msra.mxu1 %v907_v14  ;;  %v955_v51 = vpack.c.bf16 %v542_v50, %v541_v49  ;;  %v544_v62 = vld [vmem:[#allocation5 + $0x78] sm:$0xff]  ;;  %v755_v0 = vld [vmem:[%s1399_s4] ss:$0 sm:$0xff]  ;;  %p1092_p8 = por %p1091_p7, %p1090_p4 }
  0x5e   : > { %912 = vmatprep.subr.bf16.mxu1 %v911_v18  ;;  %v959_v63 = vpack.c.bf16 %v544_v62, %v543_v61  ;;  %v756_v9 = vld [vmem:[%s1401_s6] ss:$0 sm:$0xff] }
  0x5f   : > { %938 = vmatpush3.bf16.msra.mxu0 %v935_v36  ;;  %p1093_p11 = pnand %p1092_p8, %p1086_p3 }
  0x60   : > { %940 = vmatprep.subr.bf16.mxu0 %v939_v39 }
  0x61   : > { %914 = vmatpush3.bf16.msra.mxu1 %v911_v18 }
  0x62   : > { %916 = vmatprep.subr.bf16.mxu1 %v915_v21 }
  0x63   : > { %942 = vmatpush3.bf16.msra.mxu0 %v939_v39 }
  0x64   : > { %944 = vmatprep.subr.bf16.mxu0 %v943_v42 }
  0x65   : > { %918 = vmatpush3.bf16.msra.mxu1 %v915_v21 }
  0x66   : > { %920 = vmatprep.subr.bf16.mxu1 %v919_v24 }
  0x67   : > { %946 = vmatpush3.bf16.msra.mxu0 %v943_v42 }
  0x68   : > { %948 = vmatprep.subr.bf16.mxu0 %v947_v45 }
  0x69   : > { %922 = vmatpush3.bf16.msra.mxu1 %v919_v24 }
  0x6a   : > { %924 = vmatprep.subr.bf16.mxu1 %v923_v27 }
  0x6b   : > { %950 = vmatpush3.bf16.msra.mxu0 %v947_v45 }
  0x6c   : > { %952 = vmatprep.subr.bf16.mxu0 %v951_v48 }
  0x6d   : > { %926 = vmatpush3.bf16.msra.mxu1 %v923_v27 }
  0x6e   : > { %928 = vmatprep.subr.bf16.mxu1 %v927_v30 }
  0x6f   : > { %954 = vmatpush3.bf16.msra.mxu0 %v951_v48 }
  0x70   : > { %956 = vmatprep.subr.bf16.mxu0 %v955_v51 }
  0x71   : > { %930 = vmatpush3.bf16.msra.mxu1 %v927_v30 }
  0x73   : > { %958 = vmatpush3.bf16.msra.mxu0 %v955_v51 }
  0x74   : > { %960 = vmatprep.subr.bf16.mxu0 %v959_v63 }
  0x77   : > { %962 = vmatpush3.bf16.msra.mxu0 %v959_v63 }
 0x12b   : > { %v815_v53 = vpop.f32.mrb[0].mxu0 }
 0x12c   : > { %v402_v54 = vpop.f32.mrb[1].mxu0  ;;  %v408_v56 = vadd.f32 %v815_v53, %v750_v52 }
 0x12d   : > { %v403_v55 = vadd.f32 %v750_v52, %v402_v54 }
 0x12f   : > { %v818_v57 = vpop.f32.mrb[2].mxu0  ;;  %851 = vmatprep.mubr.f32.mxu1 %v403_v55 }
 0x130   : > { %v412_v58 = vpop.f32.mrb[3].mxu0  ;;  %852 = vmatmul.mubr.f32.vlgmr.msra.gmra.mrb[0].mxu1 %v408_v56  ;;  %v418_v60 = vadd.f32 %v818_v57, %v750_v52 }
 0x131   : > { %v413_v59 = vadd.f32 %v750_v52, %v412_v58 }
 0x133   : > { %854 = vmatprep.mubr.f32.mxu1 %v413_v59 }
 0x134   : > { %855 = vmatmul.mubr.f32.gmra.mrb[2].mxu1 %v418_v60 }
 0x203   : > { %v853_v1 = vpop.f32.mrb[0].mxu1 }
 0x204   : > { %v510_v2 = vpop.f32.mrb[1].mxu1  ;;  %v516_v4 = vadd.f32 %v853_v1, %v755_v0 }
 0x205   : > { %v511_v3 = vadd.f32 %v755_v0, %v510_v2 }
 0x207   : > { %v856_v5 = vpop.f32.mrb[2].mxu1  ;;  %889 = vmatprep.mubr.f32.mxu0 %v511_v3 }
 0x208   : > { %v520_v6 = vpop.f32.mrb[3].mxu1  ;;  %890 = vmatmul.mubr.f32.vlgmr.msra.gmra.mrb[4].mxu0 %v516_v4  ;;  %v526_v8 = vadd.f32 %v856_v5, %v755_v0 }
 0x209   : > { %v521_v7 = vadd.f32 %v755_v0, %v520_v6 }
 0x20b   : > { %892 = vmatprep.mubr.f32.mxu0 %v521_v7 }
 0x20c   : > { %893 = vmatmul.mubr.f32.gmra.mrb[6].mxu0 %v526_v8 }
 0x2db   : > { %v891_v10 = vpop.f32.mrb[4].mxu0 }
 0x2dc   : > { %v624_v11 = vadd.f32 %v891_v10, %v756_v9  ;;  %v618_v12 = vpop.f32.mrb[5].mxu0 }
 0x2dd   : > { %v619_v13 = vadd.f32 %v756_v9, %v618_v12 }
 0x2de   : > { %638 = vst [vmem:[%s302_s13 + $0x8] sm:$0xff] %v624_v11 }
 0x2df   : > { %637 = vst [vmem:[%s302_s13] sm:$0xff] %v619_v13  ;;  %v894_v14 = vpop.f32.mrb[6].mxu0 }
 0x2e0   : > { %v634_v15 = vadd.f32 %v894_v14, %v756_v9  ;;  %v628_v16 = vpop.f32.mrb[7].mxu0 }
 0x2e1   : > { %v629_v17 = vadd.f32 %v756_v9, %v628_v16 }
 0x2e2   : > { %640 = vst [vmem:[%s302_s13 + $0x18] sm:$0xff] %v634_v15 }
 0x2e3   : > { %639 = vst [vmem:[%s302_s13 + $0x10] sm:$0xff] %v629_v17 }
 0x2e4   : > { %1096 = shalt.err (!%p1093_p11)
}
 0x2e5   : > { %s1097_s15 = scalar_lea.hbm %s1352_s22, 512  ;;  %s1101_s16 = scalar_lea.hbm %s1402_s7, 1024 }
 0x2e6   : > { %p1098_p13 = scmp.ne.s32.totalorder %s1352_s22, %s1097_s15  ;;  %p1102_p6 = scmp.lt.u32.totalorder %s1352_s22, %s1402_s7 }
 0x2e7   : > { %p1103_p9 = scmp.lt.u32.totalorder %s1101_s16, %s1097_s15  ;;  %p1105_p12 = scmp.lt.u32.totalorder %s1097_s15, %s1352_s22 }
 0x2e8   : > { %p1099_p5 = pnand %p1098_p13, %p1416_p1 }
 0x2e9   : > { %p1104_p10 = por %p1103_p9, %p1102_p6 }
 0x2ea   : > { %p1100_p0 = pneg %p1099_p5 }
 0x2eb   : > { %p1106_p2 = por %p1105_p12, %p1104_p10 }
 0x2ed   : > { %p1107_p3 = pnand %p1106_p2, %p1100_p0 }
 0x2ef   : > { %1110 = shalt.err (!%p1107_p3)
}
 0x2f0   : > { %s1160_s17 = smov 128   ;;  %s1161_s20 = smov 8  }
 0x2f1   : > { %971 = dma.vmem_to_hbm [thread:$0]  (%p1416_p1), %s1347_s14, 512, %s1352_s22, %s1354_s23, %s1160_s17, %s1160_s17, %s1161_s20  }
 0x2f2 PF: > { %p988_p4 = scmp.ge.s32.totalorder %s1153_s27, 2  ;;  %s670_s21 = sand.u32 1, %s1141_s24  }
 0x2f3   : > { %p1417_p7 = scmp.ne.s32.totalorder %s1408_s12, 0  ;;  %s671_s28 = scalar_lea.sflag [#allocation4], %s670_s21 }
 0x2f5   : > { %p981_p8 = pnand %p988_p4, %p1417_p7 }
 0x2f7   : > { %1136 = dma.done.wait (!%p981_p8), %s671_s28, 512  }
 0x2f8   : > { %1138 = vsyncadd (!%p981_p8), %s671_s28, 4294966784  ;;  %s1418_s29 = sld [smem:[#allocation11_spill]]  ;;  %p19_p11 = scmp.ge.s32.totalorder %s1227_s30, 4  }
 0x2f9   : > { %s1419_s24 = smov %s1145_s25  ;;  %s1420_s25 = smov %s1149_s26 }
 0x2fa   : > { %s1422_s27 = smov %s1227_s30  ;;  %21 = sbr.rel (!%p19_p11) target bundleno = 5 (0x5), region = 92 }
 0x2fe   : > { %s1421_s26 = smov %s1418_s29 }
 0x301   :  { %676 = vsyncpa [#allocation3], 1 }
 0x302   :  { %678 = vsyncpa [#allocation3 + $0x1], 1 }
 0x303   :  { %679 = vsyncpa [#allocation6], 1 }
 0x304   :  { %680 = vsyncpa [#allocation4], 1 }
 0x305   :  { %682 = vsyncpa [#allocation4 + $0x1], 1 }

</bundles_post_ra>
